<compile_context>
chip_gen: v7x
topology: tpu7x:2x2x1
jax: 0.10.0
libtpu: 0.0.40
codegen_flags: <defaults>
</compile_context>

<pallas_src>
import jax
import jax.numpy as jnp
from jax.experimental import pallas as pl
from jax.experimental.pallas import tpu as pltpu


def _sub_kernel(xs_ref, xo_ref, o_ref):
    # xs_ref: (1, K, Jt) selected sample rows; xo_ref: (1, 1, Jt) offset row.
    # Broadcast subtract over the K (sublane) axis — pure VPU work.
    o_ref[...] = xs_ref[...] - xo_ref[...]


def _lane_tile(J, K, itemsize, B):
    """Lane-tile width: multiple of 128, small VMEM footprint, >=2 programs."""
    if J <= 128:
        return J                                   # single full-width block
    # ~1.5 MiB per (K, Jt) buffer keeps 2x in + 2x out + offset comfortably
    # inside v5e's 16 MiB scoped-VMEM default (and v7x's 64 MiB physical VMEM).
    cap = max(128, ((1536 * 1024) // max(K * itemsize, 1)) // 128 * 128)
    jt = min(cap, 2048)
    if B == 1:
        # guarantee >= 2 lane tiles so both v7x TensorCores get work
        half = max(128, ((-(-J // 2)) + 127) // 128 * 128)
        jt = min(jt, half)
    if jt >= J:
        jt = J                                     # full-dim block is always legal
    return jt


def sample_part_forward(x, part, offset, *, min_kernel_elems=32 * 1024):
    """x: (B, dim, J); part = (back, forw); offset: static python int or None.

    Returns (B, K, J), K = forw - back — matches SamplePart_Layer.forward.
    """
    back, forw = int(part[0]), int(part[1])
    K = forw - back
    B, I, J = x.shape
    assert 0 < K, "part must select at least one sample row"
    assert 0 <= back and forw <= I, "part out of range for dim"

    # Only the K selected rows are ever touched.
    x_sel = x[:, back:forw, :]                                  # (B, K, J)

    if offset is None:
        # One-hot einsum with no offset degenerates to a row slice: no kernel.
        return x_sel

    # offset must be a static Python int (negative allowed, like torch indexing).
    off = int(offset)
    if off < 0:
        off += I
    assert 0 <= off < I, "offset out of range for dim"
    x_off = x[:, off:off + 1, :]                                # (B, 1, J)

    # Tiny problems: per-step Pallas overhead + launch cost dominate; a fused
    # XLA subtract is strictly faster.
    if K * B * J < min_kernel_elems:
        return x_sel - x_off

    itemsize = jnp.dtype(x.dtype).itemsize
    Jt = _lane_tile(J, K, itemsize, B)
    grid = (B, pl.cdiv(J, Jt))

    cost = pl.CostEstimate(
        flops=K * B * J,
        transcendentals=0,
        bytes_accessed=(2 * K * B * J + B * J) * itemsize,
    )

    out = pl.pallas_call(
        _sub_kernel,
        out_shape=jax.ShapeDtypeStruct((B, K, J), x.dtype),
        grid=grid,
        in_specs=[
            pl.BlockSpec((1, K, Jt), lambda b, j: (b, 0, j)),
            pl.BlockSpec((1, 1, Jt), lambda b, j: (b, 0, j)),
        ],
        out_specs=pl.BlockSpec((1, K, Jt), lambda b, j: (b, 0, j)),
        compiler_params=pltpu.CompilerParams(
            dimension_semantics=("parallel", "parallel"),
            allow_input_fusion=[True, True],   # fuse the row slices into operands
        ),
        cost_estimate=cost,
    )(x_sel, x_off)

    return out


def make_selection_matrix(dim, part, dtype=jnp.float32):
    """W[i, back + i] = 1 (mirrors SamplePart_Layer.__init__) — reference only."""
    back, forw = part
    K = forw - back
    rows = jnp.arange(K)
    cols = back + rows
    W = jnp.zeros((K, dim), dtype=dtype)
    W = W.at[rows, cols].set(1.0)
    return W


if __name__ == "__main__":
    key = jax.random.PRNGKey(0)

    # --- tiny case (module-scale shapes), offset path, forced through the kernel ---
    B, DIM, J = 2, 8, 4
    part = (1, 5)            # back=1, forw=5 -> K=4
    offset = 2
    x = jax.random.normal(key, (B, DIM, J), dtype=jnp.float32)
    W = make_selection_matrix(DIM, part)

    out = jax.block_until_ready(sample_part_forward(x, part, offset, min_kernel_elems=0))
    x_shift = x - x[:, offset][:, None, :]
    ref = jnp.einsum("bij,ki->bkj", x_shift, W)
    assert out.shape == (B, part[1] - part[0], J)
    assert jnp.allclose(out, ref, atol=1e-5, rtol=1e-5)

    # --- same tiny case through the default fast path (no kernel launch) ---
    out_fp = jax.block_until_ready(sample_part_forward(x, part, offset))
    assert jnp.allclose(out_fp, ref, atol=1e-5, rtol=1e-5)

    # --- offset=None path: pure slice, no kernel ---
    out_n = jax.block_until_ready(sample_part_forward(x, part, None))
    ref_n = jnp.einsum("bij,ki->bkj", x, W)
    assert jnp.allclose(out_n, ref_n, atol=1e-5, rtol=1e-5)

    # --- medium case that naturally takes the Pallas kernel path ---
    B2, DIM2, J2 = 4, 16, 1024
    part2 = (0, 16)          # K=16
    offset2 = -1             # negative offset, like torch indexing
    x2 = jax.random.normal(jax.random.PRNGKey(0), (B2, DIM2, J2), dtype=jnp.float32)
    W2 = make_selection_matrix(DIM2, part2)

    out2 = jax.block_until_ready(sample_part_forward(x2, part2, offset2))
    x2_shift = x2 - x2[:, offset2][:, None, :]
    ref2 = jnp.einsum("bij,ki->bkj", x2_shift, W2)
    assert out2.shape == (B2, part2[1] - part2[0], J2)
    assert jnp.allclose(out2, ref2, atol=1e-5, rtol=1e-5)

    print("KERNEL_OK")
</pallas_src>

<mosaic_0001>
module attributes {stable_mosaic.version = 11 : i64} {
  func.func @_sub_kernel(%arg0: i32, %arg1: i32, %arg2: memref<1x4x4xf32, #tpu.memory_space<vmem>>, %arg3: memref<1x1x4xf32, #tpu.memory_space<vmem>>, %arg4: memref<1x4x4xf32, #tpu.memory_space<vmem>>) attributes {dimension_semantics = [#tpu.dimension_semantics<parallel>, #tpu.dimension_semantics<parallel>], iteration_bounds = array<i64: 2, 1>, scalar_prefetch = 0 : i64, scratch_operands = 0 : i64, tpu.core_type = #tpu.core_type<tc>, window_params = [{transform_indices = @transform_0, window_bounds = array<i64: 1, 4, 4>}, {transform_indices = @transform_1, window_bounds = array<i64: 1, 1, 4>}, {transform_indices = @transform_2, window_bounds = array<i64: 1, 4, 4>}]} {
    %c0 = arith.constant 0 : index
    %c0_0 = arith.constant 0 : index
    %c0_1 = arith.constant 0 : index
    %0 = vector.load %arg2[%c0, %c0_0, %c0_1] : memref<1x4x4xf32, #tpu.memory_space<vmem>>, vector<1x4x4xf32>
    %c0_2 = arith.constant 0 : index
    %c0_3 = arith.constant 0 : index
    %c0_4 = arith.constant 0 : index
    %1 = vector.load %arg3[%c0_2, %c0_3, %c0_4] : memref<1x1x4xf32, #tpu.memory_space<vmem>>, vector<1x1x4xf32>
    %2 = vector.broadcast %1 : vector<1x1x4xf32> to vector<1x4x4xf32>
    %3 = arith.subf %0, %2 : vector<1x4x4xf32>
    %c0_5 = arith.constant 0 : index
    %c0_6 = arith.constant 0 : index
    %c0_7 = arith.constant 0 : index
    %4 = vector.load %arg4[%c0_5, %c0_6, %c0_7] : memref<1x4x4xf32, #tpu.memory_space<vmem>>, vector<1x4x4xf32>
    tpu.vector_store %arg4[%c0_5, %c0_6, %c0_7], %3 {strides = array<i32>} : memref<1x4x4xf32, #tpu.memory_space<vmem>>, vector<1x4x4xf32>,
    return
  }
  func.func @transform_0(%arg0: i32, %arg1: i32) -> (i32, i32, i32) {
    %c0_i32 = arith.constant 0 : i32
    %c0_i32_0 = arith.constant 0 : i32
    return %arg0, %c0_i32, %arg1 : i32, i32, i32
  }
  func.func @transform_1(%arg0: i32, %arg1: i32) -> (i32, i32, i32) {
    %c0_i32 = arith.constant 0 : i32
    %c0_i32_0 = arith.constant 0 : i32
    return %arg0, %c0_i32, %arg1 : i32, i32, i32
  }
  func.func @transform_2(%arg0: i32, %arg1: i32) -> (i32, i32, i32) {
    %c0_i32 = arith.constant 0 : i32
    %c0_i32_0 = arith.constant 0 : i32
    return %arg0, %c0_i32, %arg1 : i32, i32, i32
  }
}

</mosaic_0001>

<bundles_post_ra>
// kernel: tpu_custom_call.1
= control target key start
LH: loop header
LB: loop body
LE: loop exit
PB: predicated region body
PF: predicated region fallthrough
CT: control target
= control target key end

     0   :  { %7 = vsyncpa [#allocation3], 0  ;;  %s703_s0 = inlined_call_operand.hbm [shape: f32[2,4,4], index: 0, kind: input, shape index: {}]   ;;  %s704_s1 = inlined_call_operand.vmem [shape: f32[2,1,4], index: 1, kind: input, shape index: {}]   ;;  %s705_s2 = inlined_call_operand.hbm [shape: f32[2,4,4], index: 2, kind: output, shape index: {}]  }
   0x1   :  { %9 = vsyncpa [#allocation3 + $0x1], 0 }
   0x2   :  { %10 = vsyncpa [#allocation4], 0 }
   0x3   :  { %12 = vsyncpa [#allocation4 + $0x1], 0  ;;  %s526_s9 = smov 0   ;;  %s528_s10 = smov 0  }
   0x4   :  { %s530_s11 = smov 0   ;;  %s532_s12 = smov 0  }
   0x5   :  { %s534_s13 = smov 0   ;;  %s536_s14 = smov 0  }
   0x6 LB: > { %s319_s15 = sadd.s32 4294967295, %s507_s14   ;;  %s320_s16 = sadd.s32 4294967294, %s507_s14   ;;  %s507_s14 = sphi %s536_s14, %s18_s14   ;;  %s503_s13 = sphi %s534_s13, %s721_s13   ;;  %s499_s12 = sphi %s532_s12, %s720_s12   ;;  %s495_s11 = sphi %s530_s11, %s719_s11   ;;  %s491_s10 = sphi %s528_s10, %s718_s10   ;;  %s487_s9 = sphi %s526_s9, %s717_s9  }
   0x7   : > { %s30_s17 = sadd.s32 1, %s503_s13  ;;  %s39_s18 = sadd.s32 1, %s495_s11 }
   0x8   : > { %p32_p0 = scmp.ge.s32.totalorder %s30_s17, 2  ;;  %p46_p1 = scmp.ne.s32.totalorder %s495_s11, %s491_s10 }
   0x9   : > { %p47_p2 = scmp.eq.s32.totalorder %s507_s14, 0  ;;  %p52_p3 = scmp.ne.s32.totalorder %s491_s10, %s487_s9 }
   0xa   : > { %s723_s17 = smov (%p32_p0, %s30_s17), 0  ;;  %p53_p5 = scmp.eq.s32.totalorder %s319_s15, 0 }
   0xb   : > { %p567_p4 = por %p47_p2, %p46_p1  ;;  %s34_s20 = ssub.s32 %s503_s13, %s723_s17 }
   0xc   : > { %p106_p6 = scmp.eq.s32.totalorder %s319_s15, 1  ;;  %p37_p7 = scmp.eq.s32.totalorder %s34_s20, 0 }
   0xd   : > { %p573_p8 = por %p53_p5, %p52_p3  ;;  %p112_p10 = scmp.eq.s32.totalorder %s320_s16, 1 }
   0xe   : > { %p577_p9 = por %p106_p6, %p46_p1  ;;  %p345_p13 = scmp.lt.s32.totalorder %s507_s14, 2 }
   0xf   : > { %s582_s23 = scalar_select %p37_p7, %s495_s11, %s39_s18  }
  0x10   : > { %s709_s22 = scalar_select %p577_p9, 1, 0 }
  0x11   : > { %p584_p11 = por %p112_p10, %p52_p3  ;;  %s132_s25 = sand.u32 1, %s495_s11  }
  0x12   : > { %s323_s26 = sshll.u32 %s132_s25, 2  ;;  %s324_s27 = sshll.u32 %s503_s13, 6 }
  0x13   : > { %s710_s24 = scalar_select %p584_p11, 1, 0 }
  0x14   : > { %s595_s30 = scalar_lea.hbm %s703_s0, %s324_s27  ;;  %s136_s3 = scalar_lea.vmem [#allocation2], %s323_s26 }
  0x15   : > { %s144_s4 = sshll.u32 %s136_s3, 4  ;;  %p601_p0 = pnand %p345_p13, %p567_p4  ;;  %s597_s4 = int_to_ptr.vmem [resolvable:$true] %s144_s4 }
  0x16   : > { %s133_s6 = scalar_lea.sflag [#allocation3], %s132_s25  ;;  %s395_s7 = scalar_lea.hbm %s595_s30, 64 }
  0x17   : > { %p396_p3 = scmp.ne.s32.totalorder %s595_s30, %s395_s7  ;;  %p397_p5 = pneg %p601_p0 }
  0x18   : > { %s400_s16 = scalar_lea.hbm %s703_s0, 128  ;;  %p401_p4 = scmp.lt.u32.totalorder %s595_s30, %s703_s0 }
  0x19   : > { %p398_p6 = pnand %p397_p5, %p396_p3  ;;  %p402_p10 = scmp.lt.u32.totalorder %s400_s16, %s395_s7 }
  0x1a   : > { %p404_p12 = scmp.lt.u32.totalorder %s395_s7, %s595_s30 }
  0x1b   : > { %p399_p7 = pneg %p398_p6  ;;  %p403_p13 = por %p402_p10, %p401_p4 }
  0x1d   : > { %p405_p1 = por %p404_p12, %p403_p13 }
  0x1f   : > { %p406_p2 = pnand %p405_p1, %p399_p7 }
  0x21   : > { %409 = shalt.err (!%p406_p2)
}
  0x22   : > { %s410_s20 = scalar_lea.vmem %s597_s4, 64  ;;  %s509_s25 = smov [#allocation2]  }
  0x23   : > { %p411_p3 = scmp.ne.s32.totalorder %s597_s4, %s410_s20  ;;  %s415_s26 = sshll.u32 %s509_s25, 4  ;;  %s416_s26 = int_to_ptr.vmem [resolvable:$false] %s415_s26 }
  0x24   : > { %s417_s27 = scalar_lea.vmem %s416_s26, 128  ;;  %p418_p9 = scmp.lt.s32.totalorder %s597_s4, %s416_s26 }
  0x25   : > { %p413_p6 = pnand %p411_p3, %p397_p5  ;;  %p419_p4 = scmp.lt.s32.totalorder %s417_s27, %s410_s20 }
  0x27   : > { %p414_p11 = pneg %p413_p6  ;;  %p420_p10 = por %p419_p4, %p418_p9 }
  0x29   : > { %p421_p12 = pnand %p420_p10, %p414_p11 }
  0x2b   : > { %424 = shalt.err (!%p421_p12)
}
  0x2c   : > { %340 = dma.hbm_to_vmem [thread:$0]  (!%p601_p0), %s595_s30, 64, %s597_s4, %s133_s6  }
  0x2d   : > { %p712_p1 = scmp.lt.s32.totalorder %s507_s14, 3  ;;  %p713_p2 = scmp.ge.s32.totalorder %s507_s14, 1 }
  0x2f   : > { %p159_p5 = pnand %p713_p2, %p712_p1 }
  0x30   : > { %s637_s28 = sand.u32 (!%p159_p5), 1, %s491_s10  }
  0x31   : > { %162 = sbr.rel (%p159_p5) target bundleno = 85 (0x55), region = 28  ;;  %s326_s29 = sshll.u32 (!%p159_p5), %s637_s28, 2 }
  0x32   : > { %s165_s3 = scalar_lea.sflag (!%p159_p5), [#allocation3], %s637_s28  ;;  %s168_s7 = scalar_lea.vmem (!%p159_p5), [#allocation2], %s326_s29 }
  0x38   : > { %478 = dma.done.wait (%p573_p8), %s165_s3, 64  }
  0x39   : > { %480 = vsyncadd (%p573_p8), %s165_s3, 4294967232  ;;  %p195_p9 = scmp.lt.s32.totalorder %s499_s12, 1  ;;  %s194_s8 = scalar_lea.vmem [#allocation5], %s326_s29  ;;  %v201_v0 = vld [vmem:[%s168_s7] sm:$0xf]  ;;  %vm210_vm0 = vcmask 27648  }
  0x3a   : > { %s227_s15 = sshll.u32 %s194_s8, 4  ;;  %s330_s16 = sshll.u32 %s499_s12, 6  ;;  %s651_s15 = int_to_ptr.vmem [resolvable:$true] %s227_s15 }
  0x3b   : > { %s196_s30 = scalar_select %p195_p9, %s499_s12, 1 }
  0x3c   : > { %s656_s19 = scalar_lea.hbm %s705_s2, %s330_s16  ;;  %s213_s20 = scalar_lea.sflag [#allocation4], %s637_s28 }
  0x3d   : > { %s200_s6 = scalar_lea.vmem %s704_s1, %s196_s30  ;;  %s425_s25 = scalar_lea.vmem %s651_s15, 64 }
  0x3e   : > { %v328_v1 = vld [vmem:[%s200_s6] ss:$0 sm:$0xff]  ;;  %p426_p8 = scmp.ne.s32.totalorder %s651_s15, %s425_s25  ;;  %p714_p11 = scmp.ne.s32.totalorder %s709_s22, 0 }
  0x3f   : > { %v209_v2 = vsub.f32 %v201_v0, %v328_v1  ;;  %s510_s12 = smov [#allocation5]  }
  0x40   : > { %p427_p0 = pnand %p426_p8, %p714_p11  ;;  %s429_s26 = sshll.u32 %s510_s12, 4  ;;  %s430_s26 = int_to_ptr.vmem [resolvable:$false] %s429_s26 }
  0x41   : > { %211 = vst.msk [vmem:[%s194_s8] sm:$0xf] %vm210_vm0, %v209_v2  ;;  %s431_s27 = scalar_lea.vmem %s430_s26, 128  ;;  %p432_p13 = scmp.lt.s32.totalorder %s651_s15, %s430_s26 }
  0x42   : > { %p428_p7 = pneg %p427_p0  ;;  %p433_p3 = scmp.lt.s32.totalorder %s431_s27, %s425_s25 }
  0x44   : > { %p434_p6 = por %p433_p3, %p432_p13 }
  0x46   : > { %p435_p4 = pnand %p434_p6, %p428_p7 }
  0x48   : > { %438 = shalt.err (!%p435_p4)
}
  0x49   : > { %s439_s28 = scalar_lea.hbm %s656_s19, 64  ;;  %s443_s7 = scalar_lea.hbm %s705_s2, 128 }
  0x4a   : > { %p440_p10 = scmp.ne.s32.totalorder %s656_s19, %s439_s28  ;;  %p444_p2 = scmp.lt.u32.totalorder %s656_s19, %s705_s2 }
  0x4b   : > { %p445_p5 = scmp.lt.u32.totalorder %s443_s7, %s439_s28  ;;  %p447_p8 = scmp.lt.u32.totalorder %s439_s28, %s656_s19 }
  0x4c   : > { %p441_p12 = pnand %p440_p10, %p714_p11 }
  0x4d   : > { %p446_p9 = por %p445_p5, %p444_p2 }
  0x4e   : > { %p442_p1 = pneg %p441_p12 }
  0x4f   : > { %p448_p0 = por %p447_p8, %p446_p9 }
  0x51   : > { %p449_p7 = pnand %p448_p0, %p442_p1 }
  0x53   : > { %452 = shalt.err (!%p449_p7)
}
  0x54   : > { %335 = dma.vmem_to_hbm [thread:$0]  (%p714_p11), %s651_s15, 64, %s656_s19, %s213_s20  }
  0x55 PF: > { %s239_s5 = sand.u32 1, %s487_s9   ;;  %p715_p13 = scmp.ne.s32.totalorder %s710_s24, 0 }
  0x56   : > { %p716_p3 = scmp.ge.s32.totalorder %s507_s14, 2  ;;  %s240_s6 = scalar_lea.sflag [#allocation4], %s239_s5 }
  0x58   : > { %p342_p6 = pnand %p716_p3, %p715_p13 }
  0x5a   : > { %482 = dma.done.wait (!%p342_p6), %s240_s6, 64  }
  0x5b   : > { %484 = vsyncadd (!%p342_p6), %s240_s6, 4294967232  ;;  %s18_s14 = sadd.s32 1, %s507_s14   ;;  %s717_s9 = smov %s491_s10 }
  0x5c   : > { %p15_p4 = scmp.ge.s32.totalorder %s18_s14, 4   ;;  %s718_s10 = smov %s495_s11 }
  0x5d   : > { %s719_s11 = smov %s582_s23  ;;  %s720_s12 = smov %s503_s13 }
  0x5e   : > { %s721_s13 = smov %s723_s17  ;;  %17 = sbr.rel (!%p15_p4) target bundleno = 6 (0x6), region = 76 }
  0x65   :  { %245 = vsyncpa [#allocation3], 1 }
  0x66   :  { %247 = vsyncpa [#allocation3 + $0x1], 1 }
  0x67   :  { %248 = vsyncpa [#allocation4], 1 }
  0x68   :  { %250 = vsyncpa [#allocation4 + $0x1], 1 }

</bundles_post_ra>
